<compile_context>
chip_gen: v5e
topology: v5e:2x2
jax: 0.10.0
libtpu: 0.0.40
codegen_flags: <defaults>
</compile_context>

<pallas_src>
import jax
import jax.numpy as jnp
from jax.experimental import pallas as pl
from jax.experimental.pallas import tpu as pltpu

N_STATES = 3      # Pendulum-v0 observation dim
N_ACTIONS = 1     # Pendulum-v0 action dim
HIDDEN = 30

LANE = 128        # padded hidden width (lane axis)
IN_PAD = 8        # padded input feature width  (3 -> 8)
OUT_PAD = 8       # padded output feature width (1 -> 8)
SUB = 8           # sublane granularity for the batch axis
TILE_B_MAX = 4096 # batch tile cap; VMEM stays tiny even double-buffered


def _round_up(n, m):
    return ((n + m - 1) // m) * m


def _actor_kernel(x_ref, w1_ref, w2_ref, w3_ref, b1_ref, b2_ref, b3_ref, o_ref):
    # x_ref : (tile_b, 8)   bf16
    # w1_ref: (8, 128)      bf16    b1_ref: (1, 128) f32
    # w2_ref: (128, 128)    bf16    b2_ref: (1, 128) f32
    # w3_ref: (128, 8)      bf16    b3_ref: (1, 8)   f32
    # o_ref : (tile_b, 8)   f32
    x = x_ref[...]

    # Layer 1: Linear(3, 30) + ReLU  (bf16 MXU operands, f32 accumulate)
    h = jnp.dot(x, w1_ref[...], preferred_element_type=jnp.float32) + b1_ref[...]
    h = jnp.maximum(h, 0.0)

    # Layer 2: Linear(30, 30) + ReLU
    h = jnp.dot(h.astype(jnp.bfloat16), w2_ref[...],
                preferred_element_type=jnp.float32) + b2_ref[...]
    h = jnp.maximum(h, 0.0)

    # Layer 3: Linear(30, 1) + Tanh  (only 8 output lanes live; tanh on those)
    h = jnp.dot(h.astype(jnp.bfloat16), w3_ref[...],
                preferred_element_type=jnp.float32) + b3_ref[...]
    o_ref[...] = jnp.tanh(h)


def init_params(key):
    """Matches weights_init: W ~ N(0, 0.1), b = 0.
    Weights stored as (in_features, out_features) (transposed vs PyTorch)."""
    k1, k2, k3 = jax.random.split(key, 3)
    w1 = 0.1 * jax.random.normal(k1, (N_STATES, HIDDEN), jnp.float32)
    b1 = jnp.zeros((HIDDEN,), jnp.float32)
    w2 = 0.1 * jax.random.normal(k2, (HIDDEN, HIDDEN), jnp.float32)
    b2 = jnp.zeros((HIDDEN,), jnp.float32)
    w3 = 0.1 * jax.random.normal(k3, (HIDDEN, N_ACTIONS), jnp.float32)
    b3 = jnp.zeros((N_ACTIONS,), jnp.float32)
    return ((w1, b1), (w2, b2), (w3, b3))


def pack_params(params):
    """One-time packing: pad weights/biases to their kernel tile shapes so the
    per-call path does no parameter padding. Zero padding is exact: padded
    input/hidden columns contribute nothing to the matmuls and tanh(0)=0."""
    (w1, b1), (w2, b2), (w3, b3) = params

    def pad_w(w, rows, cols):
        r, c = w.shape
        return jnp.pad(w, ((0, rows - r), (0, cols - c))).astype(jnp.bfloat16)

    def pad_b(b, cols):
        return jnp.pad(b.reshape(1, -1),
                       ((0, 0), (0, cols - b.shape[0]))).astype(jnp.float32)

    return (
        pad_w(w1, IN_PAD, LANE),    # (8, 128)   bf16
        pad_w(w2, LANE, LANE),      # (128, 128) bf16
        pad_w(w3, LANE, OUT_PAD),   # (128, 8)   bf16
        pad_b(b1, LANE),            # (1, 128)   f32
        pad_b(b2, LANE),            # (1, 128)   f32
        pad_b(b3, OUT_PAD),         # (1, 8)     f32
    )


@jax.jit
def actor_forward(x, packed):
    """x: (B, N_STATES) float32. Returns (B, N_ACTIONS) float32."""
    w1_p, w2_p, w3_p, b1_p, b2_p, b3_p = packed
    B = x.shape[0]

    # Aim for >= 2 grid steps on large batches (so v7x can use both TCs),
    # capped at TILE_B_MAX and rounded to sublane granularity.
    b_aligned = _round_up(B, SUB)
    half = _round_up(pl.cdiv(b_aligned, 2), SUB)
    tile_b = max(SUB, min(TILE_B_MAX, half))
    Bp = _round_up(b_aligned, tile_b)

    # Pad batch to Bp and features 3 -> 8 lanes; bf16 input halves the
    # dominant input DMA and removes the per-step cast in the kernel.
    x_p = jnp.pad(x, ((0, Bp - B), (0, IN_PAD - N_STATES))).astype(jnp.bfloat16)

    const = lambda i: (0, 0)
    out = pl.pallas_call(
        _actor_kernel,
        out_shape=jax.ShapeDtypeStruct((Bp, OUT_PAD), jnp.float32),
        grid=(Bp // tile_b,),
        in_specs=[
            pl.BlockSpec((tile_b, IN_PAD), lambda i: (i, 0)),  # x tile per step
            pl.BlockSpec((IN_PAD, LANE), const),               # W1 resident
            pl.BlockSpec((LANE, LANE), const),                 # W2 resident
            pl.BlockSpec((LANE, OUT_PAD), const),              # W3 resident
            pl.BlockSpec((1, LANE), const),                    # b1 resident
            pl.BlockSpec((1, LANE), const),                    # b2 resident
            pl.BlockSpec((1, OUT_PAD), const),                 # b3 resident
        ],
        out_specs=pl.BlockSpec((tile_b, OUT_PAD), lambda i: (i, 0)),
        compiler_params=pltpu.CompilerParams(
            dimension_semantics=("parallel",)),
    )(x_p, w1_p, w2_p, w3_p, b1_p, b2_p, b3_p)

    # Padded rows/lanes are sliced away here; do not reuse the padded output.
    return out[:B, :N_ACTIONS]


def _bf16(a):
    return a.astype(jnp.bfloat16).astype(jnp.float32)


def actor_forward_ref_bf16(x, params):
    """Reference emulating the kernel's numerics (bf16 operands, f32 accum)."""
    (w1, b1), (w2, b2), (w3, b3) = params
    h = jnp.maximum(jnp.dot(_bf16(x), _bf16(w1)) + b1, 0.0)
    h = jnp.maximum(jnp.dot(_bf16(h), _bf16(w2)) + b2, 0.0)
    return jnp.tanh(jnp.dot(_bf16(h), _bf16(w3)) + b3)


def actor_forward_ref_f32(x, params):
    (w1, b1), (w2, b2), (w3, b3) = params
    h = jnp.maximum(x @ w1 + b1, 0.0)
    h = jnp.maximum(h @ w2 + b2, 0.0)
    return jnp.tanh(h @ w3 + b3)


if __name__ == "__main__":
    key = jax.random.PRNGKey(0)
    pkey, xkey = jax.random.split(key)
    params = init_params(pkey)
    packed = pack_params(params)   # hoisted: done once, reused per call

    B = 2
    x = jax.random.normal(xkey, (B, N_STATES), jnp.float32)

    y = jax.block_until_ready(actor_forward(x, packed))
    assert y.shape == (B, N_ACTIONS)

    # Tight check vs a reference with identical bf16-operand numerics.
    y_ref_bf16 = actor_forward_ref_bf16(x, params)
    assert jnp.allclose(y, y_ref_bf16, atol=1e-3, rtol=1e-3), (y, y_ref_bf16)

    # Looser sanity check vs the pure-float32 PyTorch-equivalent forward.
    y_ref_f32 = actor_forward_ref_f32(x, params)
    assert jnp.allclose(y, y_ref_f32, atol=5e-2, rtol=5e-2), (y, y_ref_f32)

    print("KERNEL_OK")
</pallas_src>

<mosaic_0001>
module attributes {stable_mosaic.version = 11 : i64} {
  func.func @_actor_kernel(%arg0: i32, %arg1: memref<8x8xbf16, #tpu.memory_space<vmem>>, %arg2: memref<8x128xbf16, #tpu.memory_space<vmem>>, %arg3: memref<128x128xbf16, #tpu.memory_space<vmem>>, %arg4: memref<128x8xbf16, #tpu.memory_space<vmem>>, %arg5: memref<1x128xf32, #tpu.memory_space<vmem>>, %arg6: memref<1x128xf32, #tpu.memory_space<vmem>>, %arg7: memref<1x8xf32, #tpu.memory_space<vmem>>, %arg8: memref<8x8xf32, #tpu.memory_space<vmem>>) attributes {dimension_semantics = [#tpu.dimension_semantics<parallel>], iteration_bounds = array<i64: 1>, scalar_prefetch = 0 : i64, scratch_operands = 0 : i64, tpu.core_type = #tpu.core_type<tc>, window_params = [{transform_indices = @transform_0, window_bounds = array<i64: 8, 8>}, {pipeline_mode = #tpu.pipeline_mode<synchronous>, transform_indices = @transform_1, window_bounds = array<i64: 8, 128>}, {pipeline_mode = #tpu.pipeline_mode<synchronous>, transform_indices = @transform_2, window_bounds = array<i64: 128, 128>}, {pipeline_mode = #tpu.pipeline_mode<synchronous>, transform_indices = @transform_3, window_bounds = array<i64: 128, 8>}, {pipeline_mode = #tpu.pipeline_mode<synchronous>, transform_indices = @transform_4, window_bounds = array<i64: 1, 128>}, {pipeline_mode = #tpu.pipeline_mode<synchronous>, transform_indices = @transform_5, window_bounds = array<i64: 1, 128>}, {pipeline_mode = #tpu.pipeline_mode<synchronous>, transform_indices = @transform_6, window_bounds = array<i64: 1, 8>}, {transform_indices = @transform_7, window_bounds = array<i64: 8, 8>}]} {
    %c0 = arith.constant 0 : index
    %c0_0 = arith.constant 0 : index
    %0 = vector.load %arg1[%c0, %c0_0] : memref<8x8xbf16, #tpu.memory_space<vmem>>, vector<8x8xbf16>
    %c0_1 = arith.constant 0 : index
    %c0_2 = arith.constant 0 : index
    %1 = vector.load %arg2[%c0_1, %c0_2] : memref<8x128xbf16, #tpu.memory_space<vmem>>, vector<8x128xbf16>
    %cst = arith.constant dense<0.000000e+00> : vector<8x128xf32>
    %2 = tpu.matmul %0, %1, %cst {dimension_numbers = #tpu.dot_dimension_numbers<[1], [0], [0], [1], [0, 0, 1, 1], [], []>} : vector<8x8xbf16>, vector<8x128xbf16>, vector<8x128xf32> -> vector<8x128xf32>
    %c0_3 = arith.constant 0 : index
    %c0_4 = arith.constant 0 : index
    %3 = vector.load %arg5[%c0_3, %c0_4] : memref<1x128xf32, #tpu.memory_space<vmem>>, vector<1x128xf32>
    %4 = vector.broadcast %3 : vector<1x128xf32> to vector<8x128xf32>
    %5 = arith.addf %2, %4 : vector<8x128xf32>
    %cst_5 = arith.constant 0.000000e+00 : f32
    %6 = vector.broadcast %cst_5 : f32 to vector<8x128xf32>
    %7 = arith.maximumf %5, %6 : vector<8x128xf32>
    %8 = arith.truncf %7 : vector<8x128xf32> to vector<8x128xbf16>
    %c0_6 = arith.constant 0 : index
    %c0_7 = arith.constant 0 : index
    %9 = vector.load %arg3[%c0_6, %c0_7] : memref<128x128xbf16, #tpu.memory_space<vmem>>, vector<128x128xbf16>
    %cst_8 = arith.constant dense<0.000000e+00> : vector<8x128xf32>
    %10 = tpu.matmul %8, %9, %cst_8 {dimension_numbers = #tpu.dot_dimension_numbers<[1], [0], [0], [1], [0, 0, 1, 1], [], []>} : vector<8x128xbf16>, vector<128x128xbf16>, vector<8x128xf32> -> vector<8x128xf32>
    %c0_9 = arith.constant 0 : index
    %c0_10 = arith.constant 0 : index
    %11 = vector.load %arg6[%c0_9, %c0_10] : memref<1x128xf32, #tpu.memory_space<vmem>>, vector<1x128xf32>
    %12 = vector.broadcast %11 : vector<1x128xf32> to vector<8x128xf32>
    %13 = arith.addf %10, %12 : vector<8x128xf32>
    %cst_11 = arith.constant 0.000000e+00 : f32
    %14 = vector.broadcast %cst_11 : f32 to vector<8x128xf32>
    %15 = arith.maximumf %13, %14 : vector<8x128xf32>
    %16 = arith.truncf %15 : vector<8x128xf32> to vector<8x128xbf16>
    %c0_12 = arith.constant 0 : index
    %c0_13 = arith.constant 0 : index
    %17 = vector.load %arg4[%c0_12, %c0_13] : memref<128x8xbf16, #tpu.memory_space<vmem>>, vector<128x8xbf16>
    %cst_14 = arith.constant dense<0.000000e+00> : vector<8x8xf32>
    %18 = tpu.matmul %16, %17, %cst_14 {dimension_numbers = #tpu.dot_dimension_numbers<[1], [0], [0], [1], [0, 0, 1, 1], [], []>} : vector<8x128xbf16>, vector<128x8xbf16>, vector<8x8xf32> -> vector<8x8xf32>
    %c0_15 = arith.constant 0 : index
    %c0_16 = arith.constant 0 : index
    %19 = vector.load %arg7[%c0_15, %c0_16] : memref<1x8xf32, #tpu.memory_space<vmem>>, vector<1x8xf32>
    %20 = vector.broadcast %19 : vector<1x8xf32> to vector<8x8xf32>
    %21 = arith.addf %18, %20 : vector<8x8xf32>
    %22 = math.tanh %21 : vector<8x8xf32>
    %c0_17 = arith.constant 0 : index
    %c0_18 = arith.constant 0 : index
    %23 = vector.load %arg8[%c0_17, %c0_18] : memref<8x8xf32, #tpu.memory_space<vmem>>, vector<8x8xf32>
    tpu.vector_store %arg8[%c0_17, %c0_18], %22 {strides = array<i32>} : memref<8x8xf32, #tpu.memory_space<vmem>>, vector<8x8xf32>,
    return
  }
  func.func @transform_0(%arg0: i32) -> (i32, i32) {
    %c0_i32 = arith.constant 0 : i32
    %c0_i32_0 = arith.constant 0 : i32
    return %arg0, %c0_i32 : i32, i32
  }
  func.func @transform_1(%arg0: i32) -> (i32, i32) {
    %c0_i32 = arith.constant 0 : i32
    %c0_i32_0 = arith.constant 0 : i32
    %c0_i32_1 = arith.constant 0 : i32
    return %c0_i32, %c0_i32_0 : i32, i32
  }
  func.func @transform_2(%arg0: i32) -> (i32, i32) {
    %c0_i32 = arith.constant 0 : i32
    %c0_i32_0 = arith.constant 0 : i32
    %c0_i32_1 = arith.constant 0 : i32
    return %c0_i32, %c0_i32_0 : i32, i32
  }
  func.func @transform_3(%arg0: i32) -> (i32, i32) {
    %c0_i32 = arith.constant 0 : i32
    %c0_i32_0 = arith.constant 0 : i32
    %c0_i32_1 = arith.constant 0 : i32
    return %c0_i32, %c0_i32_0 : i32, i32
  }
  func.func @transform_4(%arg0: i32) -> (i32, i32) {
    %c0_i32 = arith.constant 0 : i32
    %c0_i32_0 = arith.constant 0 : i32
    %c0_i32_1 = arith.constant 0 : i32
    return %c0_i32, %c0_i32_0 : i32, i32
  }
  func.func @transform_5(%arg0: i32) -> (i32, i32) {
    %c0_i32 = arith.constant 0 : i32
    %c0_i32_0 = arith.constant 0 : i32
    %c0_i32_1 = arith.constant 0 : i32
    return %c0_i32, %c0_i32_0 : i32, i32
  }
  func.func @transform_6(%arg0: i32) -> (i32, i32) {
    %c0_i32 = arith.constant 0 : i32
    %c0_i32_0 = arith.constant 0 : i32
    %c0_i32_1 = arith.constant 0 : i32
    return %c0_i32, %c0_i32_0 : i32, i32
  }
  func.func @transform_7(%arg0: i32) -> (i32, i32) {
    %c0_i32 = arith.constant 0 : i32
    %c0_i32_0 = arith.constant 0 : i32
    return %arg0, %c0_i32 : i32, i32
  }
}

</mosaic_0001>

<bundles_post_ra>
// kernel: actor_forward.1
= control target key start
LH: loop header
LB: loop body
LE: loop exit
PB: predicated region body
PF: predicated region fallthrough
CT: control target
= control target key end

     0   :  { %vm37_vm0 = vcmask 1043456   ;;  %vm33_vm1 = vcmask 64512   ;;  %s420_s1 = inlined_call_operand.vmem [shape: bf16[8,128], index: 1, kind: input, shape index: {}]   ;;  %s421_s0 = inlined_call_operand.vmem [shape: bf16[8,8], index: 0, kind: input, shape index: {}]   ;;  %s422_s2 = inlined_call_operand.vmem [shape: bf16[128,128], index: 2, kind: input, shape index: {}]   ;;  %s423_s4 = inlined_call_operand.vmem [shape: f32[1,128], index: 4, kind: input, shape index: {}]   ;;  %s424_s5 = inlined_call_operand.vmem [shape: f32[1,128], index: 5, kind: input, shape index: {}]   ;;  %s425_s3 = inlined_call_operand.vmem [shape: bf16[128,8], index: 3, kind: input, shape index: {}]   ;;  %s426_s6 = inlined_call_operand.vmem [shape: f32[1,8], index: 6, kind: input, shape index: {}]   ;;  %s427_s7 = inlined_call_operand.vmem [shape: f32[8,8], index: 7, kind: output, shape index: {}]  }
   0x1   :  { %v28_v0 = vld [vmem:[%s420_s1] sm:$0xf]  ;;  %v298_v1 = vld [vmem:[%s422_s2 + $0x38] sm:$0xff]  ;;  %v297_v4 = vld [vmem:[%s422_s2 + $0x30] sm:$0xff] }
   0x2   :  { %v39_v2 = vsel %vm37_vm0, %v28_v0, 0  ;;  %v27_v3 = vld [vmem:[%s421_s0] sm:$0xf]  ;;  %124 = vmatpush.bf16.msra.mxu1 %v298_v1  ;;  %v296_v5 = vld [vmem:[%s422_s2 + $0x28] sm:$0xff]  ;;  %v294_v7 = vld [vmem:[%s422_s2 + $0x18] sm:$0xff] }
   0x3   :  { %48 = vmatpush.bf16.msra.mxu0 %v39_v2  ;;  %v295_v6 = vld [vmem:[%s422_s2 + $0x20] sm:$0xff]  ;;  %v293_v8 = vld [vmem:[%s422_s2 + $0x10] sm:$0xff]  ;;  %v292_v9 = vld [vmem:[%s422_s2 + $0x8] sm:$0xff] }
   0x4   :  { %v291_v10 = vld [vmem:[%s422_s2] sm:$0xff]  ;;  %v306_v11 = vld [vmem:[%s425_s3 + $0x38] sm:$0xff]  ;;  %v305_v12 = vld [vmem:[%s425_s3 + $0x30] sm:$0xff] }
   0x5   :  { %207 = vmatpush.bf16.msra.mxu2 %v306_v11  ;;  %v304_v13 = vld [vmem:[%s425_s3 + $0x28] sm:$0xff]  ;;  %v303_v14 = vld [vmem:[%s425_s3 + $0x20] sm:$0xff]  ;;  %v302_v15 = vld [vmem:[%s425_s3 + $0x18] sm:$0xff] }
   0x6   :  { %226 = vmatmul.msk.bf16.vlgmr.msra.gmra.mxu0 %vm33_vm1, %v27_v3  ;;  %125 = vmatpush.bf16.msra.mxu1 %v297_v4  ;;  %v301_v16 = vld [vmem:[%s425_s3 + $0x10] sm:$0xff]  ;;  %v307_v17 = vld [vmem:[%s423_s4] ss:$0 sm:$0xff]  ;;  %v300_v23 = vld [vmem:[%s425_s3 + $0x8] sm:$0xff] }
   0x7   :  { %v299_v24 = vld [vmem:[%s425_s3] sm:$0xff] }
   0x8   :  { %v308_v25 = vld [vmem:[%s424_s5] ss:$0 sm:$0xff] }
   0x9   :  { %208 = vmatpush.bf16.msra.mxu2 %v305_v12  ;;  %v309_v31 = vld [vmem:[%s426_s6] ss:$0 sm:$0xff] }
   0xa   :  { %126 = vmatpush.bf16.msra.mxu1 %v296_v5 }
   0xd   :  { %209 = vmatpush.bf16.msra.mxu2 %v304_v13 }
   0xe   :  { %127 = vmatpush.bf16.msra.mxu1 %v295_v6 }
  0x11   :  { %210 = vmatpush.bf16.msra.mxu2 %v303_v14 }
  0x12   :  { %128 = vmatpush.bf16.msra.mxu1 %v294_v7 }
  0x15   :  { %211 = vmatpush.bf16.msra.mxu2 %v302_v15 }
  0x16   :  { %129 = vmatpush.bf16.msra.mxu1 %v293_v8 }
  0x19   :  { %212 = vmatpush.bf16.msra.mxu2 %v301_v16 }
  0x1a   :  { %130 = vmatpush.bf16.msra.mxu1 %v292_v9 }
  0x1d   :  { %213 = vmatpush.bf16.msra.mxu2 %v300_v23 }
  0x1e   :  { %131 = vmatpush.bf16.msra.mxu1 %v291_v10 }
  0x21   :  { %214 = vmatpush.bf16.msra.mxu2 %v299_v24 }
  0x83   :  { %v50_v18 = vpop.f32.mrf.mxu0 }
  0x84   :  { %v51_v19 = vadd.f32 %v307_v17, %v50_v18 }
  0x86   :  { %v54_v20 = vmax.f32 %v51_v19, 0.0 }
  0x88   :  { %v55_v21 = vpack.c.bf16 %v54_v20, %v54_v20 }
  0x8a   :  { %132 = vmatmul.bf16.vlgmr.msra.gmra.mxu1 %v55_v21 }
  0x8b   :  { %v52_v22 = vpop.f32.mrf.mxu0 }
 0x107   :  { %v133_v26 = vpop.f32.mrf.mxu1 }
 0x108   :  { %v134_v27 = vadd.f32 %v308_v25, %v133_v26 }
 0x10a   :  { %v137_v28 = vmax.f32 %v134_v27, 0.0 }
 0x10c   :  { %v138_v29 = vpack.c.bf16 %v137_v28, %v137_v28 }
 0x10e   :  { %215 = vmatmul.bf16.vlgmr.msra.gmra.mxu2 %v138_v29 }
 0x10f   :  { %v135_v30 = vpop.f32.mrf.mxu1 }
 0x191   :  { %v216_v32 = vpop.f32.mrf.mxu2 }
 0x192   :  { %v217_v33 = vadd.f32 %v309_v31, %v216_v32 }
 0x194   :  { %310 = vtanh.f32 %v217_v33 }
 0x199   :  { %v218_v34 = vpop.f32.mrf.mxu2 }
 0x19a   :  { %v311_v35 = vpop.eup %310 }
 0x19b   :  { %221 = vst.msk [vmem:[%s427_s7] sm:$0xff] %vm33_vm1, %v311_v35 }

</bundles_post_ra>
